<compile_context>
chip_gen: v7x
topology: tpu7x:2x2x1
jax: 0.10.0
libtpu: 0.0.40
codegen_flags: <defaults>
</compile_context>

<pallas_src>
import functools

import jax
import jax.numpy as jnp
from jax.experimental import pallas as pl
from jax.experimental.pallas import tpu as pltpu

ALPHA = 1.0
GAMMA = 2.0            # handled as an explicit square below
LANES = 128            # lane (fast) axis
MAX_ROW_TILE = 8192    # (8192,128) f32 = 4 MiB per block per input


def _num_partials():
    """2 on chips whose megacore splits 'parallel' grid axes (v7x), 1 on v5e/v6e."""
    try:
        kind = jax.devices()[0].device_kind.lower()
    except Exception:
        return 2
    if "v5" in kind or "v6" in kind:
        return 1      # single TensorCore per chip
    return 2          # v7x (2 TCs/chip) and other megacore parts


def _bce_partial_sum_kernel(x_ref, t_ref, psum_ref, acc_ref, *,
                            steps, row_tile, acc_rows):
    i = pl.program_id(1)   # reduction axis (last in grid)

    @pl.when(i == 0)
    def _():
        acc_ref[...] = jnp.zeros_like(acc_ref)

    x = x_ref[...].astype(jnp.float32)
    t = t_ref[...].astype(jnp.float32)

    # Numerically-stable BCE with logits (same as PyTorch):
    #   loss = max(x, 0) - x*t + log1p(exp(-|x|))
    bce = jnp.maximum(x, 0.0) - x * t + jnp.log1p(jnp.exp(-jnp.abs(x)))

    # vreg-shaped accumulation: regroup rows into (acc_rows, 128) slabs and add them
    # elementwise (pure VPU).  acc_rows = 32 gives 4 independent vreg-add chains.
    acc_ref[...] += bce.reshape(row_tile // acc_rows, acc_rows, LANES).sum(axis=0)

    @pl.when(i == steps - 1)
    def _():
        # Single cross-lane/sublane (XLU) reduce per core, once at the end.
        psum_ref[...] = jnp.sum(acc_ref[...]).reshape(1, 1, 1)


def focal_loss(inputs, target):
    """inputs, target: arrays of identical shape (e.g. NCHW logits / targets)."""
    assert inputs.shape == target.shape
    n = int(inputs.size)

    x_flat = inputs.reshape(-1).astype(jnp.float32)
    t_flat = target.reshape(-1).astype(jnp.float32)

    num_partials = _num_partials()
    rows_full = n // LANES          # number of complete 128-lane rows
    bce_sum = jnp.float32(0.0)
    main_rows = 0

    if rows_full >= 8 * num_partials:
        # Choose the block count first, then size row_tile to cover rows_full as
        # evenly as possible (remainder < 8 * num_blocks rows, handled below by jnp).
        steps = max(1, pl.cdiv(rows_full, num_partials * MAX_ROW_TILE))
        row_tile = min(MAX_ROW_TILE,
                       (rows_full // (num_partials * steps)) // 8 * 8)
        main_rows = num_partials * steps * row_tile

        # Zero-copy: the exactly-tiled prefix is just an offset-0 reshape.
        x2 = x_flat[: main_rows * LANES].reshape(main_rows, LANES)
        t2 = t_flat[: main_rows * LANES].reshape(main_rows, LANES)

        acc_rows = 32 if row_tile % 32 == 0 else 8
        block_bytes = row_tile * LANES * 4
        # 2 inputs x 2 pipeline buffers x block, plus margin for output/scratch;
        # keep <= 32 MiB so we stay well under v7x's 64 MiB-per-TC physical VMEM.
        vmem_limit = int(min(max(4 * block_bytes + (4 << 20), 32 << 20), 48 << 20))

        kernel = functools.partial(
            _bce_partial_sum_kernel,
            steps=steps, row_tile=row_tile, acc_rows=acc_rows)

        partials = pl.pallas_call(
            kernel,
            out_shape=jax.ShapeDtypeStruct((num_partials, 1, 1), jnp.float32),
            grid_spec=pltpu.PrefetchScalarGridSpec(
                num_scalar_prefetch=0,
                grid=(num_partials, steps),
                in_specs=[
                    pl.BlockSpec((row_tile, LANES), lambda c, i: (c * steps + i, 0)),
                    pl.BlockSpec((row_tile, LANES), lambda c, i: (c * steps + i, 0)),
                ],
                out_specs=pl.BlockSpec((1, 1, 1), lambda c, i: (c, 0, 0)),
                scratch_shapes=[pltpu.VMEM((acc_rows, LANES), jnp.float32)],
            ),
            compiler_params=pltpu.CompilerParams(
                dimension_semantics=("parallel", "arbitrary"),
                vmem_limit_bytes=vmem_limit,
            ),
        )(x2, t2)
        bce_sum = jnp.sum(partials)

    # Small remainder (leftover rows + sub-128 tail): plain jnp, no padding, no copy
    # of the main data.  This is a tiny fraction of the input (or the whole input when
    # it is too small to be worth a kernel launch).
    tail_start = main_rows * LANES
    if tail_start < n:
        xt = x_flat[tail_start:]
        tt = t_flat[tail_start:]
        bce_tail = jnp.maximum(xt, 0.0) - xt * tt + jnp.log1p(jnp.exp(-jnp.abs(xt)))
        bce_sum = bce_sum + jnp.sum(bce_tail)

    # O(1) scalar focal transform (reference applies it to the already-mean BCE).
    bce_mean = bce_sum / jnp.float32(n)
    pt = jnp.exp(bce_mean)
    d = 1.0 - pt
    return ALPHA * d * d * bce_mean   # (1 - pt)**2, gamma == 2; square avoids pow NaN


def _focal_loss_ref(inputs, target):
    x = inputs.astype(jnp.float32)
    t = target.astype(jnp.float32)
    bce = jnp.maximum(x, 0.0) - x * t + jnp.log1p(jnp.exp(-jnp.abs(x)))
    bce_mean = jnp.mean(bce)
    pt = jnp.exp(bce_mean)
    d = 1.0 - pt
    return ALPHA * d * d * bce_mean


if __name__ == "__main__":
    key = jax.random.PRNGKey(0)
    k1, k2, k3, k4, k5, k6 = jax.random.split(key, 6)

    focal_loss_jit = jax.jit(focal_loss)

    # 1) Small NCHW-shaped logits / binary targets, lane-aligned (kernel-only path).
    x = jax.random.normal(k1, (2, 4, 16, 16), dtype=jnp.float32)
    t = (jax.random.uniform(k2, (2, 4, 16, 16)) > 0.5).astype(jnp.float32)
    loss = focal_loss_jit(x, t)
    jax.block_until_ready(loss)
    ref = _focal_loss_ref(x, t)
    assert jnp.allclose(loss, ref, rtol=1e-5, atol=1e-5), (loss, ref)

    # 2) Ragged size large enough to exercise kernel prefix + jnp tail (no full pad).
    xr = jax.random.normal(k3, (2, 3, 33, 37), dtype=jnp.float32)
    tr = (jax.random.uniform(k4, (2, 3, 33, 37)) > 0.5).astype(jnp.float32)
    loss_r = focal_loss_jit(xr, tr)
    jax.block_until_ready(loss_r)
    ref_r = _focal_loss_ref(xr, tr)
    assert jnp.allclose(loss_r, ref_r, rtol=1e-5, atol=1e-5), (loss_r, ref_r)

    # 3) Tiny ragged input: pure jnp fallback path.
    xs = jax.random.normal(k5, (2, 3, 7, 5), dtype=jnp.float32)
    ts = (jax.random.uniform(k6, (2, 3, 7, 5)) > 0.5).astype(jnp.float32)
    loss_s = focal_loss_jit(xs, ts)
    jax.block_until_ready(loss_s)
    ref_s = _focal_loss_ref(xs, ts)
    assert jnp.allclose(loss_s, ref_s, rtol=1e-5, atol=1e-5), (loss_s, ref_s)

    print("KERNEL_OK")
</pallas_src>

<mosaic_0001>
module attributes {stable_mosaic.version = 11 : i64} {
  func.func @_bce_partial_sum_kernel(%arg0: i32, %arg1: i32, %arg2: memref<8x128xf32, #tpu.memory_space<vmem>>, %arg3: memref<8x128xf32, #tpu.memory_space<vmem>>, %arg4: memref<1x1x1xf32, #tpu.memory_space<vmem>>, %arg5: memref<8x128xf32, #tpu.memory_space<vmem>>) attributes {dimension_semantics = [#tpu.dimension_semantics<parallel>, #tpu.dimension_semantics<arbitrary>], iteration_bounds = array<i64: 2, 1>, scalar_prefetch = 0 : i64, scratch_operands = 1 : i64, tpu.core_type = #tpu.core_type<tc>, window_params = [{transform_indices = @transform_0, window_bounds = array<i64: 8, 128>}, {transform_indices = @transform_1, window_bounds = array<i64: 8, 128>}, {transform_indices = @transform_2, window_bounds = array<i64: 1, 1, 1>}]} {
    %c0_i32 = arith.constant 0 : i32
    %0 = arith.cmpi eq, %arg1, %c0_i32 : i32
    %1 = arith.extui %0 : i1 to i32
    %c0_i32_0 = arith.constant 0 : i32
    %2 = arith.cmpi ne, %1, %c0_i32_0 : i32
    scf.if %2 {
      %cst_12 = arith.constant 0.000000e+00 : f32
      %23 = vector.broadcast %cst_12 : f32 to vector<8x128xf32>
      %c0_13 = arith.constant 0 : index
      %c0_14 = arith.constant 0 : index
      %24 = vector.load %arg5[%c0_13, %c0_14] : memref<8x128xf32, #tpu.memory_space<vmem>>, vector<8x128xf32>
      tpu.vector_store %arg5[%c0_13, %c0_14], %23 {strides = array<i32>} : memref<8x128xf32, #tpu.memory_space<vmem>>, vector<8x128xf32>,
    } else {
    }
    %c0 = arith.constant 0 : index
    %c0_1 = arith.constant 0 : index
    %3 = vector.load %arg2[%c0, %c0_1] : memref<8x128xf32, #tpu.memory_space<vmem>>, vector<8x128xf32>
    %c0_2 = arith.constant 0 : index
    %c0_3 = arith.constant 0 : index
    %4 = vector.load %arg3[%c0_2, %c0_3] : memref<8x128xf32, #tpu.memory_space<vmem>>, vector<8x128xf32>
    %cst = arith.constant 0.000000e+00 : f32
    %5 = vector.broadcast %cst : f32 to vector<8x128xf32>
    %6 = arith.maximumf %3, %5 : vector<8x128xf32>
    %7 = arith.mulf %3, %4 : vector<8x128xf32>
    %8 = arith.subf %6, %7 : vector<8x128xf32>
    %9 = math.absf %3 : vector<8x128xf32>
    %cst_4 = arith.constant 0.000000e+00 : f32
    %10 = vector.broadcast %cst_4 : f32 to vector<8x128xf32>
    %11 = arith.subf %10, %9 : vector<8x128xf32>
    %12 = math.exp %11 : vector<8x128xf32>
    %13 = math.log1p %12 : vector<8x128xf32>
    %14 = arith.addf %8, %13 : vector<8x128xf32>
    %c0_5 = arith.constant 0 : index
    %c0_6 = arith.constant 0 : index
    %15 = vector.load %arg5[%c0_5, %c0_6] : memref<8x128xf32, #tpu.memory_space<vmem>>, vector<8x128xf32>
    %16 = vector.shape_cast %14 : vector<8x128xf32> to vector<1x8x128xf32>
    %cst_7 = arith.constant dense<0.000000e+00> : vector<8x128xf32>
    %17 = vector.multi_reduction <add>, %16, %cst_7 [0] : vector<1x8x128xf32> to vector<8x128xf32>
    %18 = arith.addf %15, %17 : vector<8x128xf32>
    %c0_8 = arith.constant 0 : index
    %c0_9 = arith.constant 0 : index
    %19 = vector.load %arg5[%c0_8, %c0_9] : memref<8x128xf32, #tpu.memory_space<vmem>>, vector<8x128xf32>
    tpu.vector_store %arg5[%c0_8, %c0_9], %18 {strides = array<i32>} : memref<8x128xf32, #tpu.memory_space<vmem>>, vector<8x128xf32>,
    %c0_i32_10 = arith.constant 0 : i32
    %20 = arith.cmpi eq, %arg1, %c0_i32_10 : i32
    %21 = arith.extui %20 : i1 to i32
    %c0_i32_11 = arith.constant 0 : i32
    %22 = arith.cmpi ne, %21, %c0_i32_11 : i32
    scf.if %22 {
      %c0_12 = arith.constant 0 : index
      %c0_13 = arith.constant 0 : index
      %23 = vector.load %arg5[%c0_12, %c0_13] : memref<8x128xf32, #tpu.memory_space<vmem>>, vector<8x128xf32>
      %24 = vector.shape_cast %23 : vector<8x128xf32> to vector<1x8x128xf32>
      %cst_14 = arith.constant dense<0.000000e+00> : vector<1xf32>
      %25 = vector.multi_reduction <add>, %24, %cst_14 [1, 2] : vector<1x8x128xf32> to vector<1xf32>
      %26 = vector.shape_cast %25 : vector<1xf32> to vector<1x1x1xf32>
      %27 = vector.extract %26[0, 0, 0] : f32 from vector<1x1x1xf32>
      %28 = vector.broadcast %27 : f32 to vector<1x1x1xf32>
      %c0_15 = arith.constant 0 : index
      %c0_16 = arith.constant 0 : index
      %c0_17 = arith.constant 0 : index
      %29 = vector.load %arg4[%c0_15, %c0_16, %c0_17] : memref<1x1x1xf32, #tpu.memory_space<vmem>>, vector<1x1x1xf32>
      tpu.vector_store %arg4[%c0_15, %c0_16, %c0_17], %28 {strides = array<i32>} : memref<1x1x1xf32, #tpu.memory_space<vmem>>, vector<1x1x1xf32>,
    } else {
    }
    return
  }
  func.func @transform_0(%arg0: i32, %arg1: i32) -> (i32, i32) {
    %c1_i32 = arith.constant 1 : i32
    %0 = arith.muli %arg0, %c1_i32 : i32
    %1 = arith.addi %0, %arg1 : i32
    %c0_i32 = arith.constant 0 : i32
    %c0_i32_0 = arith.constant 0 : i32
    return %1, %c0_i32 : i32, i32
  }
  func.func @transform_1(%arg0: i32, %arg1: i32) -> (i32, i32) {
    %c1_i32 = arith.constant 1 : i32
    %0 = arith.muli %arg0, %c1_i32 : i32
    %1 = arith.addi %0, %arg1 : i32
    %c0_i32 = arith.constant 0 : i32
    %c0_i32_0 = arith.constant 0 : i32
    return %1, %c0_i32 : i32, i32
  }
  func.func @transform_2(%arg0: i32, %arg1: i32) -> (i32, i32, i32) {
    %c0_i32 = arith.constant 0 : i32
    %c0_i32_0 = arith.constant 0 : i32
    %c0_i32_1 = arith.constant 0 : i32
    return %arg0, %c0_i32, %c0_i32_0 : i32, i32, i32
  }
}

</mosaic_0001>

<bundles_post_ra>
// kernel: focal_loss.1
= control target key start
LH: loop header
LB: loop body
LE: loop exit
PB: predicated region body
PF: predicated region fallthrough
CT: control target
= control target key end

     0   :  { %s369_s9 = smov 0   ;;  %s371_s10 = smov 0   ;;  %s409_s0 = inlined_call_operand.vmem [shape: f32[16,128], index: 0, kind: input, shape index: {}]   ;;  %s410_s1 = inlined_call_operand.vmem [shape: f32[16,128], index: 1, kind: input, shape index: {}]   ;;  %s411_s2 = inlined_call_operand.vmem [shape: f32[2,1,1], index: 2, kind: output, shape index: {}]  }
   0x1   :  { %s373_s11 = smov 0  }
   0x2 LB: > { %s24_s12 = sadd.s32 1, %s348_s10  ;;  %p295_p0 = scmp.ge.s32.totalorder %s352_s11, 1  ;;  %s352_s11 = sphi %s373_s11, %s12_s11   ;;  %s348_s10 = sphi %s371_s10, %s413_s10   ;;  %s344_s9 = sphi %s369_s9, %s412_s9  }
   0x3   : > { %p26_p1 = scmp.ge.s32.totalorder %s24_s12, 2  ;;  %p140_p2 = scmp.lt.s32.totalorder %s352_s11, 3 }
   0x5   : > { %s415_s12 = smov (%p26_p1, %s24_s12), 0  ;;  %p141_p3 = pnand %p295_p0, %p140_p2 }
   0x6   : > { %p166_p4 = scmp.lt.s32.totalorder (!%p141_p3), %s344_s9, 1  ;;  %vm222_vm1 = vcmask (!%p141_p3), 0  }
   0x7   : > { %144 = sbr.rel (%p141_p3) target bundleno = 259 (0x103), region = 28 }
   0xe   : > { %s417_s9 = smov (!%p166_p4, %s344_s9), 1 }
   0xf   : > { %s296_s13 = sshll.u32 %s417_s9, 3  ;;  %s179_s22 = scalar_lea.vmem %s411_s2, %s417_s9 }
  0x10   : > { %s169_s16 = scalar_lea.vmem %s409_s0, %s296_s13  ;;  %s175_s19 = scalar_lea.vmem %s410_s1, %s296_s13 }
  0x11   : > { %v185_v0 = vld [vmem:[%s169_s16] sm:$0xff] }
  0x12   : > { %v190_v1 = vand.u32 2147483647, %v185_v0  ;;  %v186_v7 = vld [vmem:[%s175_s19] sm:$0xff]  ;;  %v187_v9 = vmax.f32 %v185_v0, 0.0 }
  0x13   : > { %v188_v10 = vmul.f32 %v186_v7, %v185_v0 }
  0x14   : > { %v191_v2 = vsub.f32 0.0, %v190_v1 }
  0x15   : > { %v189_v14 = vsub.f32 %v187_v9, %v188_v10 }
  0x16   : > { %v192_v3 = vmul.f32 1.442695, %v191_v2 }
  0x18   : > { %326 = vpow2.f32 %v192_v3 }
  0x22   : > { %v327_v4 = vpop.eup %326 }
  0x23   : > { %v194_v5 = vadd.f32 1.0, %v327_v4  ;;  %v197_v6 = vmul.f32 -0.5, %v327_v4  ;;  %v200_v11 = vand.u32 2147483647, %v327_v4 }
  0x25   : > { %328 = vlog2.f32 %v194_v5  ;;  %v198_v8 = vadd.f32 1.0, %v197_v6  ;;  %vm201_vm0 = vcmp.lt.f32.partialorder %v200_v11, 0.0004427343 }
  0x27   : > { %v199_v12 = vmul.f32 %v327_v4, %v198_v8 }
  0x2f   : > { %v329_v13 = vpop.eup %328 }
  0x30   : > { %v196_v15 = vmul.f32 0.6931472, %v329_v13 }
  0x32   : > { %v202_v16 = vsel %vm201_vm0, %v199_v12, %v196_v15 }
  0x33   : > { %v203_v17 = vadd.f32 %v202_v16, %v189_v14 }
  0x35   : > { %212 = vadd.xlane.f32.xlu0 %v203_v17 }
  0xc2   : > { %v213_v18 = vpop.xlane.xlu0 %212 }
  0xc3   : > { %v214_v19 = vrot.slane %v213_v18, 4 }
  0xc5   : > { %v215_v20 = vadd.f32 %v214_v19, %v213_v18 }
  0xc7   : > { %v216_v21 = vrot.slane %v215_v20, 2 }
  0xc9   : > { %v217_v22 = vadd.f32 %v216_v21, %v215_v20 }
  0xcb   : > { %v218_v23 = vrot.slane %v217_v22, 1 }
  0xcd   : > { %v219_v24 = vadd.f32 %v218_v23, %v217_v22 }
  0xcf   : > { %300 = vpush %v219_v24 }
 0x100   : > { %s301_s23 = spop %300 }
 0x101   : > { %v221_v25 = vstv %s301_s23 }
 0x102   : > { %223 = vst.msk [vmem:[%s179_s22] sm:$0x1] %vm222_vm1, %v221_v25 }
 0x103 PF: > { %s12_s11 = sadd.s32 1, %s352_s11   ;;  %s412_s9 = smov %s348_s10 }
 0x104   : > { %p9_p5 = scmp.ge.s32.totalorder %s12_s11, 4   ;;  %s413_s10 = smov %s415_s12 }
 0x106   :  { %11 = sbr.rel (!%p9_p5) target bundleno = 2 (0x2), region = 69 }

</bundles_post_ra>
